<compile_context>
chip_gen: v7x
topology: tpu7x:2x2x1
jax: 0.10.0
libtpu: 0.0.40
codegen_flags: <defaults>
</compile_context>

<pallas_src>
import functools

import jax
import jax.numpy as jnp
import numpy as np
from jax.experimental import pallas as pl
from jax.experimental.pallas import tpu as pltpu


def _stacked_patches(xpad, *, width, margin, hw):
    """Build the (9*C, HW) im2col patch stack for a 3x3 / pad=1 conv.

    `xpad` is a (C, margin + HW + margin) value whose lanes [margin, margin+HW)
    hold the image in row-major flat order and whose margins are zero.
    Vertically out-of-range taps land in the zero margins automatically; the
    horizontal flat-index wrap (x == 0 with dx == -1, x == W-1 with dx == +1)
    is removed with two per-column masks.
    """
    c = xpad.shape[0]
    col = jax.lax.broadcasted_iota(jnp.int32, (c, hw), 1) % width
    not_first = col != 0
    not_last = col != (width - 1)
    pieces = []
    for dy in (-1, 0, 1):
        for dx in (-1, 0, 1):
            off = margin + dy * width + dx
            p = xpad[:, off:off + hw]
            if dx == -1:
                p = jnp.where(not_first, p, 0.0)
            elif dx == 1:
                p = jnp.where(not_last, p, 0.0)
            pieces.append(p)
    return jnp.concatenate(pieces, axis=0)


def _decoder_kernel(width, margin, xc_ref, w1_ref, b1_ref, w2_ref, b2_ref,
                    o_ref):
    # xc_ref : (1, C1, HW)   upsampled-x ++ skip, channels-first, flat spatial
    # w1_ref : (Cm, 9*C1)    conv1 weights, BN1 scale folded, tap-major K order
    # b1_ref : (Cm, 1)       folded BN1 bias
    # w2_ref : (Cm, 9*Cm)    conv2 weights, BN2 scale folded
    # b2_ref : (Cm, 1)       folded BN2 bias
    # o_ref  : (1, Cm, HW)   output, lane-dense (HW multiple of 128)
    c1 = xc_ref.shape[1]
    cm = o_ref.shape[1]
    hw = o_ref.shape[2]

    # ---- conv1 (3x3, pad=1) as a single K=9*C1 GEMM + bias + ReLU ----
    zeros1 = jnp.zeros((c1, margin), jnp.float32)
    xpad = jnp.concatenate([zeros1, xc_ref[0], zeros1], axis=1)
    p1 = _stacked_patches(xpad, width=width, margin=margin, hw=hw)
    y = jnp.dot(w1_ref[...], p1, preferred_element_type=jnp.float32)
    y = jnp.maximum(y + b1_ref[...], 0.0)

    # ---- conv2 (3x3, pad=1) as a single K=9*Cm GEMM + bias + ReLU ----
    zeros2 = jnp.zeros((cm, margin), jnp.float32)
    ypad = jnp.concatenate([zeros2, y, zeros2], axis=1)
    p2 = _stacked_patches(ypad, width=width, margin=margin, hw=hw)
    z = jnp.dot(w2_ref[...], p2, preferred_element_type=jnp.float32)
    z = jnp.maximum(z + b2_ref[...], 0.0)

    o_ref[0] = z.astype(o_ref.dtype)


def _fold_bn(gamma, beta, mean, var, eps=1e-5):
    scale = gamma / jnp.sqrt(var + eps)
    bias = beta - mean * scale
    return scale, bias


def _pack_weight(w_oihw, scale):
    """(Cout, Cin, 3, 3) OIHW -> (Cout, 9*Cin), tap-major-then-channel K order,
    with the per-output-channel BN scale folded in."""
    cout, cin = w_oihw.shape[0], w_oihw.shape[1]
    w = jnp.transpose(w_oihw, (0, 2, 3, 1)).reshape(cout, 9 * cin)
    return w * scale[:, None]


@jax.jit
def decoder_block_forward(x, skip, w1, s1, b1, w2, s2, b2):
    """x: (N, Cin, H0, W0) NCHW; skip: (N, Cs, 2*H0, 2*W0) NCHW.
    w1/w2: OIHW 3x3 conv weights; s*/b*: folded BatchNorm scale/bias (Cout,).
    Returns (N, Cout, 2*H0, 2*W0) NCHW."""
    n, cin, h0, w0 = x.shape
    _, cs, height, width = skip.shape
    c1 = cin + cs
    cm = w1.shape[0]
    hw = height * width

    # F.interpolate(scale_factor=2, mode='nearest') + torch.cat([x, skip], 1)
    # (attention1 / attention2 are identity for attention_type=None).
    # Stays channels-first; reshape to flat spatial is free (contiguous).
    # TODO(synk): fold the nearest-upsample + channel concat into the kernel
    # (low-res input block + in-VMEM duplication) to drop this materialization.
    x_up = jnp.repeat(jnp.repeat(x, 2, axis=2), 2, axis=3)
    xc = jnp.concatenate([x_up, skip], axis=1).reshape(n, c1, hw)

    w1m = _pack_weight(w1, s1)          # (Cm, 9*C1), BN1 scale folded
    w2m = _pack_weight(w2, s2)          # (Cm, 9*Cm), BN2 scale folded
    b1c = b1.reshape(cm, 1)
    b2c = b2.reshape(cm, 1)

    margin = ((width + 1 + 127) // 128) * 128   # zero halo, lane-aligned

    out = pl.pallas_call(
        functools.partial(_decoder_kernel, width, margin),
        out_shape=jax.ShapeDtypeStruct((n, cm, hw), jnp.float32),
        grid_spec=pltpu.PrefetchScalarGridSpec(
            num_scalar_prefetch=0,
            grid=(n,),
            in_specs=[
                pl.BlockSpec((1, c1, hw), lambda i: (i, 0, 0)),
                pl.BlockSpec((cm, 9 * c1), lambda i: (0, 0)),
                pl.BlockSpec((cm, 1), lambda i: (0, 0)),
                pl.BlockSpec((cm, 9 * cm), lambda i: (0, 0)),
                pl.BlockSpec((cm, 1), lambda i: (0, 0)),
            ],
            out_specs=pl.BlockSpec((1, cm, hw), lambda i: (i, 0, 0)),
        ),
        compiler_params=pltpu.CompilerParams(
            dimension_semantics=("parallel",)),
    )(xc, w1m, b1c, w2m, b2c)

    return out.reshape(n, cm, height, width)


def _reference(x, skip, w1, s1, b1, w2, s2, b2):
    """Pure-JAX reference (NCHW convs via lax.conv_general_dilated)."""
    x_up = jnp.repeat(jnp.repeat(x, 2, axis=2), 2, axis=3)
    xc = jnp.concatenate([x_up, skip], axis=1)

    def conv_bn_relu(inp, w_oihw, s, b):
        y = jax.lax.conv_general_dilated(
            inp, w_oihw, window_strides=(1, 1), padding=((1, 1), (1, 1)),
            dimension_numbers=("NCHW", "OIHW", "NCHW"),
            precision=jax.lax.Precision.HIGHEST)
        y = y * s.reshape(1, -1, 1, 1) + b.reshape(1, -1, 1, 1)
        return jnp.maximum(y, 0.0)

    return conv_bn_relu(conv_bn_relu(xc, w1, s1, b1), w2, s2, b2)


if __name__ == "__main__":
    # Module config: in_channels=4, skip_channels=4, out_channels=8,
    # use_batchnorm=True, attention_type=None.
    in_channels, skip_channels, out_channels = 4, 4, 8
    n, h0, w0 = 2, 8, 8
    c1 = in_channels + skip_channels

    key = jax.random.PRNGKey(0)
    k_x, k_skip, k_w1, k_w2, k_g1, k_b1, k_g2, k_b2 = jax.random.split(key, 8)

    x = jax.random.normal(k_x, (n, in_channels, h0, w0), jnp.float32)
    skip = jax.random.normal(k_skip, (n, skip_channels, 2 * h0, 2 * w0),
                             jnp.float32)

    # Conv weights in OIHW (PyTorch) layout, bias-free (use_batchnorm=True).
    w1 = 0.1 * jax.random.normal(k_w1, (out_channels, c1, 3, 3), jnp.float32)
    w2 = 0.1 * jax.random.normal(k_w2, (out_channels, out_channels, 3, 3),
                                 jnp.float32)

    # BatchNorm params (deterministic, "pretrained-like" running stats).
    g1 = 1.0 + 0.1 * jax.random.normal(k_g1, (out_channels,), jnp.float32)
    be1 = 0.1 * jax.random.normal(k_b1, (out_channels,), jnp.float32)
    m1 = 0.05 * jnp.arange(out_channels, dtype=jnp.float32)
    v1 = 1.0 + 0.02 * jnp.arange(out_channels, dtype=jnp.float32)
    g2 = 1.0 + 0.1 * jax.random.normal(k_g2, (out_channels,), jnp.float32)
    be2 = 0.1 * jax.random.normal(k_b2, (out_channels,), jnp.float32)
    m2 = 0.03 * jnp.arange(out_channels, dtype=jnp.float32)
    v2 = 1.0 + 0.01 * jnp.arange(out_channels, dtype=jnp.float32)

    s1, b1 = _fold_bn(g1, be1, m1, v1)
    s2, b2 = _fold_bn(g2, be2, m2, v2)

    out = decoder_block_forward(x, skip, w1, s1, b1, w2, s2, b2)
    out = jax.block_until_ready(out)

    ref = _reference(x, skip, w1, s1, b1, w2, s2, b2)
    np.testing.assert_allclose(np.asarray(out), np.asarray(ref),
                               rtol=1e-4, atol=1e-4)
    assert out.shape == (n, out_channels, 2 * h0, 2 * w0)

    print("KERNEL_OK")
</pallas_src>

<mosaic_0001>
module attributes {stable_mosaic.version = 11 : i64} {
  func.func @_decoder_kernel(%arg0: i32, %arg1: memref<1x8x256xf32, #tpu.memory_space<vmem>>, %arg2: memref<8x72xf32, #tpu.memory_space<vmem>>, %arg3: memref<8x1xf32, #tpu.memory_space<vmem>>, %arg4: memref<8x72xf32, #tpu.memory_space<vmem>>, %arg5: memref<8x1xf32, #tpu.memory_space<vmem>>, %arg6: memref<1x8x256xf32, #tpu.memory_space<vmem>>) attributes {dimension_semantics = [#tpu.dimension_semantics<parallel>], iteration_bounds = array<i64: 2>, scalar_prefetch = 0 : i64, scratch_operands = 0 : i64, tpu.core_type = #tpu.core_type<tc>, window_params = [{transform_indices = @transform_0, window_bounds = array<i64: 1, 8, 256>}, {pipeline_mode = #tpu.pipeline_mode<synchronous>, transform_indices = @transform_1, window_bounds = array<i64: 8, 72>}, {pipeline_mode = #tpu.pipeline_mode<synchronous>, transform_indices = @transform_2, window_bounds = array<i64: 8, 1>}, {pipeline_mode = #tpu.pipeline_mode<synchronous>, transform_indices = @transform_3, window_bounds = array<i64: 8, 72>}, {pipeline_mode = #tpu.pipeline_mode<synchronous>, transform_indices = @transform_4, window_bounds = array<i64: 8, 1>}, {transform_indices = @transform_5, window_bounds = array<i64: 1, 8, 256>}]} {
    %cst = arith.constant 0.000000e+00 : f32
    %0 = vector.broadcast %cst : f32 to vector<8x128xf32>
    %c0 = arith.constant 0 : index
    %c0_0 = arith.constant 0 : index
    %c0_1 = arith.constant 0 : index
    %1 = vector.load %arg1[%c0, %c0_0, %c0_1] : memref<1x8x256xf32, #tpu.memory_space<vmem>>, vector<1x8x256xf32>
    %2 = vector.shape_cast %1 : vector<1x8x256xf32> to vector<8x256xf32>
    %3 = tpu.concatenate %0, %2, %0 in 1 : vector<8x128xf32>, vector<8x256xf32>, vector<8x128xf32> -> vector<8x512xf32>
    %4 = tpu.iota {dimensions = array<i32: 1>} : vector<8x256xi32>
    %c16_i32 = arith.constant 16 : i32
    %c0_i32 = arith.constant 0 : i32
    %5 = arith.cmpi eq, %c16_i32, %c0_i32 : i32
    %c1_i32 = arith.constant 1 : i32
    %6 = arith.select %5, %c1_i32, %c16_i32 : i32
    %7 = vector.broadcast %6 : i32 to vector<8x256xi32>
    %8 = arith.remsi %4, %7 : vector<8x256xi32>
    %c0_i32_2 = arith.constant 0 : i32
    %9 = vector.broadcast %c0_i32_2 : i32 to vector<8x256xi32>
    %10 = arith.cmpi ne, %8, %9 : vector<8x256xi32>
    %c0_i32_3 = arith.constant 0 : i32
    %11 = vector.broadcast %c0_i32_3 : i32 to vector<8x256xi32>
    %12 = arith.cmpi slt, %8, %11 : vector<8x256xi32>
    %c0_i32_4 = arith.constant 0 : i32
    %13 = arith.cmpi slt, %6, %c0_i32_4 : i32
    %14 = vector.broadcast %13 : i1 to vector<8x256xi1>
    %15 = vector.broadcast %14 : vector<8x256xi1> to vector<8x256xi1>
    %16 = arith.xori %12, %15 : vector<8x256xi1>
    %17 = arith.andi %16, %10 : vector<8x256xi1>
    %18 = vector.broadcast %6 : i32 to vector<8x256xi32>
    %19 = arith.addi %8, %18 : vector<8x256xi32>
    %20 = arith.select %17, %19, %8 : vector<8x256xi1>, vector<8x256xi32>
    %c0_i32_5 = arith.constant 0 : i32
    %21 = vector.broadcast %c0_i32_5 : i32 to vector<8x256xi32>
    %22 = arith.cmpi ne, %20, %21 : vector<8x256xi32>
    %c15_i32 = arith.constant 15 : i32
    %23 = vector.broadcast %c15_i32 : i32 to vector<8x256xi32>
    %24 = arith.cmpi ne, %20, %23 : vector<8x256xi32>
    %25 = vector.extract_strided_slice %3 {offsets = [0, 111], sizes = [8, 256], strides = [1, 1]} : vector<8x512xf32> to vector<8x256xf32>
    %cst_6 = arith.constant 0.000000e+00 : f32
    %26 = vector.broadcast %cst_6 : f32 to vector<8x256xf32>
    %27 = arith.select %22, %25, %26 : vector<8x256xi1>, vector<8x256xf32>
    %28 = vector.extract_strided_slice %3 {offsets = [0, 112], sizes = [8, 256], strides = [1, 1]} : vector<8x512xf32> to vector<8x256xf32>
    %29 = vector.extract_strided_slice %3 {offsets = [0, 113], sizes = [8, 256], strides = [1, 1]} : vector<8x512xf32> to vector<8x256xf32>
    %cst_7 = arith.constant 0.000000e+00 : f32
    %30 = vector.broadcast %cst_7 : f32 to vector<8x256xf32>
    %31 = arith.select %24, %29, %30 : vector<8x256xi1>, vector<8x256xf32>
    %32 = vector.extract_strided_slice %3 {offsets = [0, 127], sizes = [8, 256], strides = [1, 1]} : vector<8x512xf32> to vector<8x256xf32>
    %cst_8 = arith.constant 0.000000e+00 : f32
    %33 = vector.broadcast %cst_8 : f32 to vector<8x256xf32>
    %34 = arith.select %22, %32, %33 : vector<8x256xi1>, vector<8x256xf32>
    %35 = vector.extract_strided_slice %3 {offsets = [0, 128], sizes = [8, 256], strides = [1, 1]} : vector<8x512xf32> to vector<8x256xf32>
    %36 = vector.extract_strided_slice %3 {offsets = [0, 129], sizes = [8, 256], strides = [1, 1]} : vector<8x512xf32> to vector<8x256xf32>
    %cst_9 = arith.constant 0.000000e+00 : f32
    %37 = vector.broadcast %cst_9 : f32 to vector<8x256xf32>
    %38 = arith.select %24, %36, %37 : vector<8x256xi1>, vector<8x256xf32>
    %39 = vector.extract_strided_slice %3 {offsets = [0, 143], sizes = [8, 256], strides = [1, 1]} : vector<8x512xf32> to vector<8x256xf32>
    %cst_10 = arith.constant 0.000000e+00 : f32
    %40 = vector.broadcast %cst_10 : f32 to vector<8x256xf32>
    %41 = arith.select %22, %39, %40 : vector<8x256xi1>, vector<8x256xf32>
    %42 = vector.extract_strided_slice %3 {offsets = [0, 144], sizes = [8, 256], strides = [1, 1]} : vector<8x512xf32> to vector<8x256xf32>
    %43 = vector.extract_strided_slice %3 {offsets = [0, 145], sizes = [8, 256], strides = [1, 1]} : vector<8x512xf32> to vector<8x256xf32>
    %cst_11 = arith.constant 0.000000e+00 : f32
    %44 = vector.broadcast %cst_11 : f32 to vector<8x256xf32>
    %45 = arith.select %24, %43, %44 : vector<8x256xi1>, vector<8x256xf32>
    %46 = tpu.concatenate %27, %28, %31, %34, %35, %38, %41, %42, %45 in 0 : vector<8x256xf32>, vector<8x256xf32>, vector<8x256xf32>, vector<8x256xf32>, vector<8x256xf32>, vector<8x256xf32>, vector<8x256xf32>, vector<8x256xf32>, vector<8x256xf32> -> vector<72x256xf32>
    %c0_12 = arith.constant 0 : index
    %c0_13 = arith.constant 0 : index
    %47 = vector.load %arg2[%c0_12, %c0_13] : memref<8x72xf32, #tpu.memory_space<vmem>>, vector<8x72xf32>
    %cst_14 = arith.constant dense<0.000000e+00> : vector<8x256xf32>
    %48 = tpu.matmul %47, %46, %cst_14 {dimension_numbers = #tpu.dot_dimension_numbers<[1], [0], [0], [1], [0, 0, 1, 1], [], []>} : vector<8x72xf32>, vector<72x256xf32>, vector<8x256xf32> -> vector<8x256xf32>
    %c0_15 = arith.constant 0 : index
    %c0_16 = arith.constant 0 : index
    %49 = vector.load %arg3[%c0_15, %c0_16] : memref<8x1xf32, #tpu.memory_space<vmem>>, vector<8x1xf32>
    %50 = vector.broadcast %49 : vector<8x1xf32> to vector<8x256xf32>
    %51 = arith.addf %48, %50 : vector<8x256xf32>
    %cst_17 = arith.constant 0.000000e+00 : f32
    %52 = vector.broadcast %cst_17 : f32 to vector<8x256xf32>
    %53 = arith.maximumf %51, %52 : vector<8x256xf32>
    %cst_18 = arith.constant 0.000000e+00 : f32
    %54 = vector.broadcast %cst_18 : f32 to vector<8x128xf32>
    %55 = tpu.concatenate %54, %53, %54 in 1 : vector<8x128xf32>, vector<8x256xf32>, vector<8x128xf32> -> vector<8x512xf32>
    %56 = tpu.iota {dimensions = array<i32: 1>} : vector<8x256xi32>
    %c16_i32_19 = arith.constant 16 : i32
    %c0_i32_20 = arith.constant 0 : i32
    %57 = arith.cmpi eq, %c16_i32_19, %c0_i32_20 : i32
    %c1_i32_21 = arith.constant 1 : i32
    %58 = arith.select %57, %c1_i32_21, %c16_i32_19 : i32
    %59 = vector.broadcast %58 : i32 to vector<8x256xi32>
    %60 = arith.remsi %56, %59 : vector<8x256xi32>
    %c0_i32_22 = arith.constant 0 : i32
    %61 = vector.broadcast %c0_i32_22 : i32 to vector<8x256xi32>
    %62 = arith.cmpi ne, %60, %61 : vector<8x256xi32>
    %c0_i32_23 = arith.constant 0 : i32
    %63 = vector.broadcast %c0_i32_23 : i32 to vector<8x256xi32>
    %64 = arith.cmpi slt, %60, %63 : vector<8x256xi32>
    %c0_i32_24 = arith.constant 0 : i32
    %65 = arith.cmpi slt, %58, %c0_i32_24 : i32
    %66 = vector.broadcast %65 : i1 to vector<8x256xi1>
    %67 = vector.broadcast %66 : vector<8x256xi1> to vector<8x256xi1>
    %68 = arith.xori %64, %67 : vector<8x256xi1>
    %69 = arith.andi %68, %62 : vector<8x256xi1>
    %70 = vector.broadcast %58 : i32 to vector<8x256xi32>
    %71 = arith.addi %60, %70 : vector<8x256xi32>
    %72 = arith.select %69, %71, %60 : vector<8x256xi1>, vector<8x256xi32>
    %c0_i32_25 = arith.constant 0 : i32
    %73 = vector.broadcast %c0_i32_25 : i32 to vector<8x256xi32>
    %74 = arith.cmpi ne, %72, %73 : vector<8x256xi32>
    %c15_i32_26 = arith.constant 15 : i32
    %75 = vector.broadcast %c15_i32_26 : i32 to vector<8x256xi32>
    %76 = arith.cmpi ne, %72, %75 : vector<8x256xi32>
    %77 = vector.extract_strided_slice %55 {offsets = [0, 111], sizes = [8, 256], strides = [1, 1]} : vector<8x512xf32> to vector<8x256xf32>
    %cst_27 = arith.constant 0.000000e+00 : f32
    %78 = vector.broadcast %cst_27 : f32 to vector<8x256xf32>
    %79 = arith.select %74, %77, %78 : vector<8x256xi1>, vector<8x256xf32>
    %80 = vector.extract_strided_slice %55 {offsets = [0, 112], sizes = [8, 256], strides = [1, 1]} : vector<8x512xf32> to vector<8x256xf32>
    %81 = vector.extract_strided_slice %55 {offsets = [0, 113], sizes = [8, 256], strides = [1, 1]} : vector<8x512xf32> to vector<8x256xf32>
    %cst_28 = arith.constant 0.000000e+00 : f32
    %82 = vector.broadcast %cst_28 : f32 to vector<8x256xf32>
    %83 = arith.select %76, %81, %82 : vector<8x256xi1>, vector<8x256xf32>
    %84 = vector.extract_strided_slice %55 {offsets = [0, 127], sizes = [8, 256], strides = [1, 1]} : vector<8x512xf32> to vector<8x256xf32>
    %cst_29 = arith.constant 0.000000e+00 : f32
    %85 = vector.broadcast %cst_29 : f32 to vector<8x256xf32>
    %86 = arith.select %74, %84, %85 : vector<8x256xi1>, vector<8x256xf32>
    %87 = vector.extract_strided_slice %55 {offsets = [0, 128], sizes = [8, 256], strides = [1, 1]} : vector<8x512xf32> to vector<8x256xf32>
    %88 = vector.extract_strided_slice %55 {offsets = [0, 129], sizes = [8, 256], strides = [1, 1]} : vector<8x512xf32> to vector<8x256xf32>
    %cst_30 = arith.constant 0.000000e+00 : f32
    %89 = vector.broadcast %cst_30 : f32 to vector<8x256xf32>
    %90 = arith.select %76, %88, %89 : vector<8x256xi1>, vector<8x256xf32>
    %91 = vector.extract_strided_slice %55 {offsets = [0, 143], sizes = [8, 256], strides = [1, 1]} : vector<8x512xf32> to vector<8x256xf32>
    %cst_31 = arith.constant 0.000000e+00 : f32
    %92 = vector.broadcast %cst_31 : f32 to vector<8x256xf32>
    %93 = arith.select %74, %91, %92 : vector<8x256xi1>, vector<8x256xf32>
    %94 = vector.extract_strided_slice %55 {offsets = [0, 144], sizes = [8, 256], strides = [1, 1]} : vector<8x512xf32> to vector<8x256xf32>
    %95 = vector.extract_strided_slice %55 {offsets = [0, 145], sizes = [8, 256], strides = [1, 1]} : vector<8x512xf32> to vector<8x256xf32>
    %cst_32 = arith.constant 0.000000e+00 : f32
    %96 = vector.broadcast %cst_32 : f32 to vector<8x256xf32>
    %97 = arith.select %76, %95, %96 : vector<8x256xi1>, vector<8x256xf32>
    %98 = tpu.concatenate %79, %80, %83, %86, %87, %90, %93, %94, %97 in 0 : vector<8x256xf32>, vector<8x256xf32>, vector<8x256xf32>, vector<8x256xf32>, vector<8x256xf32>, vector<8x256xf32>, vector<8x256xf32>, vector<8x256xf32>, vector<8x256xf32> -> vector<72x256xf32>
    %c0_33 = arith.constant 0 : index
    %c0_34 = arith.constant 0 : index
    %99 = vector.load %arg4[%c0_33, %c0_34] : memref<8x72xf32, #tpu.memory_space<vmem>>, vector<8x72xf32>
    %cst_35 = arith.constant dense<0.000000e+00> : vector<8x256xf32>
    %100 = tpu.matmul %99, %98, %cst_35 {dimension_numbers = #tpu.dot_dimension_numbers<[1], [0], [0], [1], [0, 0, 1, 1], [], []>} : vector<8x72xf32>, vector<72x256xf32>, vector<8x256xf32> -> vector<8x256xf32>
    %c0_36 = arith.constant 0 : index
    %c0_37 = arith.constant 0 : index
    %101 = vector.load %arg5[%c0_36, %c0_37] : memref<8x1xf32, #tpu.memory_space<vmem>>, vector<8x1xf32>
    %102 = vector.broadcast %101 : vector<8x1xf32> to vector<8x256xf32>
    %103 = arith.addf %100, %102 : vector<8x256xf32>
    %cst_38 = arith.constant 0.000000e+00 : f32
    %104 = vector.broadcast %cst_38 : f32 to vector<8x256xf32>
    %105 = arith.maximumf %103, %104 : vector<8x256xf32>
    %c0_39 = arith.constant 0 : index
    %c0_40 = arith.constant 0 : index
    %c0_41 = arith.constant 0 : index
    %106 = vector.load %arg6[%c0_39, %c0_40, %c0_41] : memref<1x8x256xf32, #tpu.memory_space<vmem>>, vector<1x8x256xf32>
    %107 = vector.shape_cast %106 : vector<1x8x256xf32> to vector<8x256xf32>
    %108 = vector.shape_cast %105 : vector<8x256xf32> to vector<1x8x256xf32>
    tpu.vector_store %arg6[%c0_39, %c0_40, %c0_41], %108 {strides = array<i32>} : memref<1x8x256xf32, #tpu.memory_space<vmem>>, vector<1x8x256xf32>,
    return
  }
  func.func @transform_0(%arg0: i32) -> (i32, i32, i32) {
    %c0_i32 = arith.constant 0 : i32
    %c0_i32_0 = arith.constant 0 : i32
    %c0_i32_1 = arith.constant 0 : i32
    return %arg0, %c0_i32, %c0_i32_0 : i32, i32, i32
  }
  func.func @transform_1(%arg0: i32) -> (i32, i32) {
    %c0_i32 = arith.constant 0 : i32
    %c0_i32_0 = arith.constant 0 : i32
    %c0_i32_1 = arith.constant 0 : i32
    return %c0_i32, %c0_i32_0 : i32, i32
  }
  func.func @transform_2(%arg0: i32) -> (i32, i32) {
    %c0_i32 = arith.constant 0 : i32
    %c0_i32_0 = arith.constant 0 : i32
    %c0_i32_1 = arith.constant 0 : i32
    return %c0_i32, %c0_i32_0 : i32, i32
  }
  func.func @transform_3(%arg0: i32) -> (i32, i32) {
    %c0_i32 = arith.constant 0 : i32
    %c0_i32_0 = arith.constant 0 : i32
    %c0_i32_1 = arith.constant 0 : i32
    return %c0_i32, %c0_i32_0 : i32, i32
  }
  func.func @transform_4(%arg0: i32) -> (i32, i32) {
    %c0_i32 = arith.constant 0 : i32
    %c0_i32_0 = arith.constant 0 : i32
    %c0_i32_1 = arith.constant 0 : i32
    return %c0_i32, %c0_i32_0 : i32, i32
  }
  func.func @transform_5(%arg0: i32) -> (i32, i32, i32) {
    %c0_i32 = arith.constant 0 : i32
    %c0_i32_0 = arith.constant 0 : i32
    %c0_i32_1 = arith.constant 0 : i32
    return %arg0, %c0_i32, %c0_i32_0 : i32, i32, i32
  }
}

</mosaic_0001>

<bundles_post_ra>
// kernel: decoder_block_forward.1
= control target key start
LH: loop header
LB: loop body
LE: loop exit
PB: predicated region body
PF: predicated region fallthrough
CT: control target
= control target key end

     0   :  { %s890_s18 = smov 0   ;;  %s1148_s0 = inlined_call_operand.vmem [shape: f32[2,8,256], index: 0, kind: input, shape index: {}]   ;;  %s1149_s1 = inlined_call_operand.vmem [shape: f32[8,72], index: 1, kind: input, shape index: {}]   ;;  %s1150_s2 = inlined_call_operand.vmem [shape: f32[8,1], index: 2, kind: input, shape index: {}]   ;;  %s1151_s3 = inlined_call_operand.vmem [shape: f32[8,72], index: 3, kind: input, shape index: {}]   ;;  %s1152_s4 = inlined_call_operand.vmem [shape: f32[8,1], index: 4, kind: input, shape index: {}]   ;;  %s1153_s5 = inlined_call_operand.vmem [shape: f32[2,8,256], index: 5, kind: output, shape index: {}]  }
   0x1 LB: > { %s663_s19 = sadd.s32 4294967295, %s847_s18   ;;  %p667_p0 = scmp.ge.s32.totalorder %s847_s18, 1  ;;  %s847_s18 = sphi %s890_s18, %s15_s18  }
   0x2   : > { %p187_p1 = scmp.lt.s32.totalorder %s847_s18, 3 }
   0x4   : > { %p188_p2 = pnand %p667_p0, %p187_p1 }
   0x5   : > { %p215_p3 = scmp.lt.s32.totalorder (!%p188_p2), %s663_s19, 1  ;;  %v849_v0 = vmov (!%p188_p2), 0.0   ;;  %s850_s20 = smov (!%p188_p2), 17   ;;  %v362_v5 = vld [vmem:[%s1150_s2] sm:$0xff] (!%p188_p2)  ;;  %v858_v6 = vmov (!%p188_p2), 0   ;;  %v227_v7 = vlaneseq (!%p188_p2)  ;;  %vm267_vm0 = vcmask (!%p188_p2), 138240  }
   0x6   : > { %191 = sbr.rel (%p188_p2) target bundleno = 743 (0x2e7), region = 40  ;;  %261 = vrot.lane.b32.xlu1 (!%p188_p2), %v849_v0, %s850_s20  ;;  %436 = vmatprep.mubr.f32.mxu0 (!%p188_p2), %v849_v0  ;;  %s851_s25 = smov (!%p188_p2), 16   ;;  %vm345_vm2 = vcmask (!%p188_p2), 130048   ;;  %vm293_vm4 = vcmask (!%p188_p2), 7168   ;;  %vm859_vm5 = vmmov (!%p188_p2), 1   ;;  %vm280_vm8 = vcmask (!%p188_p2), 121856  }
   0x7   : > { %597 = vmatprep.mubr.f32.mxu1 (!%p188_p2), %v849_v0  ;;  %s852_s26 = smov (!%p188_p2), 1   ;;  %s853_s27 = smov (!%p188_p2), 15   ;;  %804 = vset.pattern.permute.xlu1 (!%p188_p2), %v858_v6  ;;  %v228_v9 = vand.u32 (!%p188_p2), 127, %v227_v7  ;;  %vm1155_vm13 = vcmask (!%p188_p2), 1039360   ;;  %vm1156_vm14 = vcmask (!%p188_p2), 916480  }
   0x8   : > { %s854_s28 = smov (!%p188_p2), 127   ;;  %s855_s29 = smov (!%p188_p2), 112   ;;  %840 = vset.pattern.permute.xlu0 (!%p188_p2), %v858_v6 }
   0x9   : > { %s856_s30 = smov (!%p188_p2), 113   ;;  %s857_s6 = smov (!%p188_p2), 111   ;;  %v229_v11 = vadd.s32 (!%p188_p2), 128, %v228_v9  ;;  %v234_v15 = vand.u32 (!%p188_p2), 15, %v228_v9 }
   0xa   : > { %339 = vrot.lane.b32.xlu1 (!%p188_p2), %v849_v0, %s851_s25 }
   0xb   : > { %v241_v14 = vand.u32 (!%p188_p2), 15, %v229_v11  ;;  %vm946_vm3 = vcmp.ne.s32.totalorder (!%p188_p2), %v234_v15, 0  ;;  %vm979_vm10 = vcmp.ne.s32.totalorder (!%p188_p2), %v234_v15, 15 }
   0xc   : > { %vm968_vm7 = vmpackc.low (!%p188_p2), %vm859_vm5, %vm946_vm3 }
   0xd   : > { %s1179_s19 = smov (!%p215_p3, %s663_s19), 1  ;;  %vm942_vm1 = vcmp.ne.s32.totalorder %v241_v14, 0  ;;  %vm972_vm9 = vcmp.ne.s32.totalorder %v241_v14, 15  ;;  %vm1154_vm12 = vmpackc.low %vm946_vm3, %vm979_vm10 }
   0xe   : > { %s700_s21 = sshll.u32 %s1179_s19, 4  ;;  %vm957_vm6 = vmpackc.low %vm859_vm5, %vm942_vm1 }
   0xf   : > { %s219_s24 = scalar_lea.vmem %s1148_s0, %s700_s21  ;;  %vm709_vm11 = vmpackc.low %vm942_vm1, %vm972_vm9  ;;  %vm1176_vm1 = vcmask 916480   ;;  %s224_s17 = scalar_lea.vmem %s1153_s5, %s700_s21 }
  0x10   : > { %v908_v1 = vld [vmem:[%s219_s24] sm:$0xff]  ;;  %v910_v2 = vld [vmem:[%s219_s24 + $0x8] sm:$0xff]  ;;  %vm1025_vm15 = vmpackc.low %vm972_vm9, %vm859_vm5 }
  0x11   : > { %v769_v3 = vpack.i.bf16 %v910_v2, %v908_v1  ;;  %v799_v4 = vpack.i.bf16 %v849_v0, %v910_v2 }
  0x13   : > { %770 = vrot.lane.b32.xlu0 %v769_v3, %s850_s20  ;;  %785 = vrot.lane.b32.xlu1 %v769_v3, %s852_s26 }
  0x17   : > { %775 = vrot.lane.b32.xlu0 %v769_v3, %s851_s25  ;;  %287 = vrot.lane.b32.xlu1 %v849_v0, %s852_s26 }
  0x1b   : > { %780 = vrot.lane.b32.xlu0 %v769_v3, %s853_s27  ;;  %300 = vrot.lane.b32.xlu1 %v908_v1, %s854_s28 }
  0x1f   : > { %274 = vrot.lane.b32.xlu0 %v849_v0, %s853_s27  ;;  %800 = vrot.lane.b32.xlu1 %v799_v4, %s855_s29 }
  0x23   : > { %790 = vrot.lane.b32.xlu0 %v799_v4, %s854_s28  ;;  %350 = vrot.lane.b32.xlu1 %v908_v1, %s855_s29 }
  0x27   : > { %795 = vrot.lane.b32.xlu0 %v799_v4, %s856_s30  ;;  %330 = vrot.lane.b32.xlu1 %v849_v0, %s857_s6 }
  0x2b   : > { %313 = vrot.lane.b32.xlu0 %v908_v1, %s856_s30  ;;  %365 = vperm.xlu1 %804, %v362_v5  }
  0x2f   : > { %328 = vrot.lane.b32.xlu0 %v910_v2, %s857_s6 }
  0x33   : > { %326 = vrot.lane.b32.xlu0 %v908_v1, %s857_s6 }
  0x78   : > { %v938_v8 = vpop.permute.xlu1 %261 }
  0x7c   : > { %v940_v10 = vpop.permute.xlu1 %339 }
  0x85   : > { %v771_v12 = vpop.permute.xlu0 %770  ;;  %v786_v13 = vpop.permute.xlu1 %785 }
  0x86   : > { %v773_v16 = vunpack.i.h.bf16 %v771_v12  ;;  %v772_v17 = vunpack.i.l.bf16 %v771_v12  ;;  %v788_v24 = vunpack.i.h.bf16 %v786_v13  ;;  %v787_v25 = vunpack.i.l.bf16 %v786_v13  ;;  %v361_v12 = vld [vmem:[%s1149_s1] sm:$0xff] }
  0x88   : > { %v269_v26 = vsel %vm267_vm0, %v772_v17, %v773_v16  ;;  %v268_v29 = vsel %vm267_vm0, %v938_v8, %v772_v17  ;;  %v295_v39 = vsel %vm293_vm4, %v787_v25, %v788_v24 }
  0x89   : > { %v776_v18 = vpop.permute.xlu0 %775  ;;  %v950_v21 = vpop.permute.xlu1 %287 }
  0x8a   : > { %v778_v22 = vunpack.i.h.bf16 %v776_v18  ;;  %v777_v23 = vunpack.i.l.bf16 %v776_v18  ;;  %v294_v41 = vsel %vm293_vm4, %v950_v21, %v787_v25 }
  0x8c   : > { %v347_v27 = vsel %vm345_vm2, %v777_v23, %v778_v22  ;;  %v346_v30 = vsel %vm345_vm2, %v940_v10, %v777_v23 }
  0x8d   : > { %v781_v31 = vpop.permute.xlu0 %780  ;;  %v702_v32 = vpack.c.bf16 %v347_v27, %v269_v26  ;;  %v705_v33 = vpack.c.bf16 %v346_v30, %v268_v29  ;;  %v301_v36 = vpop.permute.xlu1 %300  ;;  %v524_v26 = vld [vmem:[%s1152_s4] sm:$0xff] }
  0x8e   : > { %v783_v37 = vunpack.i.h.bf16 %v781_v31  ;;  %v782_v38 = vunpack.i.l.bf16 %v781_v31 }
  0x8f   : > { %704 = vmatprep.subr.msk.bf16.mxu0 %vm957_vm6, %v702_v32 }
  0x90   : > { %707 = vmatpush1.bf16.msk.msra.mxu0 %vm968_vm7, %v705_v33  ;;  %v282_v42 = vsel %vm280_vm8, %v782_v38, %v783_v37 }
  0x91   : > { %v992_v43 = vpop.permute.xlu0 %274  ;;  %v708_v44 = vpack.c.bf16 %v295_v39, %v282_v42  ;;  %v1005_v47 = vpop.permute.xlu1 %800 }
  0x92   : > { %v281_v45 = vsel %vm280_vm8, %v992_v43, %v782_v38  ;;  %v803_v51 = vunpack.i.h.bf16 %v1005_v47  ;;  %v802_v52 = vunpack.i.l.bf16 %v1005_v47  ;;  %v523_v47 = vld [vmem:[%s1151_s3] sm:$0xff] }
  0x93   : > { %v711_v46 = vpack.c.bf16 %v294_v41, %v281_v45  ;;  %710 = vmatprep.subr.msk.bf16.mxu0 %vm709_vm11, %v708_v44 }
  0x94   : > { %v358_v63 = vsel %vm1156_vm14, %v802_v52, %v803_v51 }
  0x95   : > { %v1007_v48 = vpop.permute.xlu0 %790  ;;  %713 = vmatpush1.bf16.msk.msra.mxu0 %vm1154_vm12, %v711_v46  ;;  %vm1036_vm12 = vmpackc.low %vm979_vm10, %vm859_vm5  ;;  %v351_v60 = vpop.permute.xlu1 %350  ;;  %vm332_vm5 = vcmask 908288  }
  0x96   : > { %v793_v49 = vunpack.i.h.bf16 %v1007_v48  ;;  %v792_v50 = vunpack.i.l.bf16 %v1007_v48  ;;  %v357_v0 = vsel %vm1156_vm14, %v351_v60, %v802_v52  ;;  %vm368_vm14 = vcmask 588800  }
  0x98   : > { %v307_v53 = vsel %vm1155_vm13, %v301_v36, %v792_v50  ;;  %v308_v54 = vsel %vm1155_vm13, %v792_v50, %v793_v49  ;;  %vm319_vm13 = vcmask 924672  }
  0x99   : > { %v714_v56 = vpack.c.bf16 %v308_v54, %v910_v2  ;;  %v717_v57 = vpack.c.bf16 %v307_v53, %v908_v1  ;;  %v1031_v58 = vpop.permute.xlu0 %795  ;;  %v1056_v6 = vpop.permute.xlu1 %330 }
  0x9a   : > { %v798_v61 = vunpack.i.h.bf16 %v1031_v58  ;;  %v797_v62 = vunpack.i.l.bf16 %v1031_v58 }
  0x9b   : > { %716 = vmatprep.subr.msk.bf16.mxu0 %vm1025_vm15, %v714_v56 }
  0x9c   : > { %719 = vmatpush1.bf16.msk.msra.mxu0 %vm1036_vm12, %v717_v57  ;;  %v321_v1 = vsel %vm319_vm13, %v797_v62, %v798_v61 }
  0x9d   : > { %v314_v2 = vpop.permute.xlu0 %313  ;;  %v720_v3 = vpack.c.bf16 %v358_v63, %v321_v1 }
  0x9e   : > { %v320_v4 = vsel %vm319_vm13, %v314_v2, %v797_v62 }
  0x9f   : > { %v723_v5 = vpack.c.bf16 %v357_v0, %v320_v4  ;;  %722 = vmatprep.subr.msk.bf16.mxu0 %vm957_vm6, %v720_v3 }
  0xa1   : > { %v329_v7 = vpop.permute.xlu0 %328  ;;  %725 = vmatpush1.bf16.msk.msra.mxu0 %vm968_vm7, %v723_v5 }
  0xa2   : > { %v334_v9 = vsel %vm332_vm5, %v329_v7, %v1056_v6 }
  0xa3   : > { %682 = vmatprep.subr.msk.mxu0 %vm972_vm9, %v334_v9 }
  0xa5   : > { %v327_v11 = vpop.permute.xlu0 %326 }
  0xa6   : > { %v333_v13 = vsel %vm332_vm5, %v327_v11, %v329_v7 }
  0xa7   : > { %683 = vmatpush1.msk.msra.mxu0 %vm979_vm10, %v333_v13 }
  0xa8   : > { %684 = vmatmul.mubr.msk.f32.vlgmr.msra.gmra.mrb[0].mxu0 %vm368_vm14, %v361_v12 }
  0xaa   : > { %v366_v14 = vpop.permute.xlu1 %365 }
 0x17b   : > { %v438_v15 = vpop.f32.mrb[0].mxu0 }
 0x17c   : > { %v439_v16 = vadd.f32 %v438_v15, %v366_v14  ;;  %v440_v17 = vpop.f32.mrb[1].mxu0 }
 0x17d   : > { %v441_v18 = vadd.f32 %v440_v17, %v366_v14 }
 0x17e   : > { %v443_v22 = vmax.f32 %v439_v16, 0.0 }
 0x17f   : > { %v444_v23 = vmax.f32 %v441_v18, 0.0 }
 0x181   : > { %v810_v24 = vpack.i.bf16 %v444_v23, %v443_v22  ;;  %v830_v25 = vpack.i.bf16 %v443_v22, %v444_v23 }
 0x183   : > { %811 = vrot.lane.b32.xlu1 %v810_v24, %s851_s25  ;;  %806 = vrot.lane.b32.xlu0 %v810_v24, %s850_s20 }
 0x187   : > { %821 = vrot.lane.b32.xlu1 %v810_v24, %s852_s26  ;;  %816 = vrot.lane.b32.xlu0 %v810_v24, %s853_s27 }
 0x18b   : > { %831 = vrot.lane.b32.xlu1 %v830_v25, %s856_s30  ;;  %826 = vrot.lane.b32.xlu0 %v830_v25, %s854_s28 }
 0x18f   : > { %499 = vrot.lane.b32.xlu1 %v444_v23, %s857_s6  ;;  %836 = vrot.lane.b32.xlu0 %v830_v25, %s855_s29 }
 0x193   : > { %527 = vperm.xlu1 %804, %v524_v26   ;;  %497 = vrot.lane.b32.xlu0 %v443_v22, %s857_s6 }
 0x1f5   : > { %v812_v27 = vpop.permute.xlu1 %811  ;;  %v807_v29 = vpop.permute.xlu0 %806 }
 0x1f6   : > { %v814_v30 = vunpack.i.h.bf16 %v812_v27  ;;  %v813_v31 = vunpack.i.l.bf16 %v812_v27  ;;  %v809_v32 = vunpack.i.h.bf16 %v807_v29  ;;  %v808_v33 = vunpack.i.l.bf16 %v807_v29 }
 0x1f8   : > { %v452_v36 = vsel %vm267_vm0, %v808_v33, %v809_v32  ;;  %v512_v37 = vsel %vm345_vm2, %v813_v31, %v814_v30  ;;  %v451_v38 = vsel %vm267_vm0, %v938_v8, %v808_v33  ;;  %v511_v39 = vsel %vm345_vm2, %v940_v10, %v813_v31 }
 0x1f9   : > { %v822_v41 = vpop.permute.xlu1 %821  ;;  %v817_v42 = vpop.permute.xlu0 %816  ;;  %v726_v44 = vpack.c.bf16 %v512_v37, %v452_v36  ;;  %v729_v45 = vpack.c.bf16 %v511_v39, %v451_v38  ;;  %vm1173_vm0 = vcmask 1039360  }
 0x1fa   : > { %v824_v46 = vunpack.i.h.bf16 %v822_v41  ;;  %v823_v50 = vunpack.i.l.bf16 %v822_v41  ;;  %v819_v52 = vunpack.i.h.bf16 %v817_v42  ;;  %v818_v53 = vunpack.i.l.bf16 %v817_v42  ;;  %vm1174_vm2 = vmmov %vm1173_vm0 }
 0x1fb   : > { %728 = vmatprep.subr.msk.bf16.mxu1 %vm957_vm6, %v726_v44 }
 0x1fc   : > { %v471_v54 = vsel %vm293_vm4, %v950_v21, %v823_v50  ;;  %v472_v56 = vsel %vm293_vm4, %v823_v50, %v824_v46  ;;  %v461_v8 = vsel %vm280_vm8, %v992_v43, %v818_v53  ;;  %v462_v10 = vsel %vm280_vm8, %v818_v53, %v819_v52  ;;  %731 = vmatpush1.bf16.msk.msra.mxu1 %vm968_vm7, %v729_v45  ;;  %vm1175_vm4 = vmpackc.low %vm946_vm3, %vm979_vm10 }
 0x1fd   : > { %v732_v57 = vpack.c.bf16 %v472_v56, %v462_v10  ;;  %v735_v60 = vpack.c.bf16 %v471_v54, %v461_v8  ;;  %v832_v62 = vpop.permute.xlu1 %831  ;;  %v827_v63 = vpop.permute.xlu0 %826  ;;  %vm1177_vm3 = vmmov %vm1176_vm1 }
 0x1fe   : > { %v829_v0 = vunpack.i.h.bf16 %v827_v63  ;;  %v828_v1 = vunpack.i.l.bf16 %v827_v63  ;;  %v834_v21 = vunpack.i.h.bf16 %v832_v62  ;;  %v833_v2 = vunpack.i.l.bf16 %v832_v62 }
 0x1ff   : > { %734 = vmatprep.subr.msk.bf16.mxu1 %vm709_vm11, %v732_v57 }
 0x200   : > { %v481_v43 = vsel %vm1173_vm0, %v829_v0, %v828_v1  ;;  %v482_v3 = vsel %vm1174_vm2, %v828_v1, %v793_v49  ;;  %737 = vmatpush1.bf16.msk.msra.mxu1 %vm1175_vm4, %v735_v60  ;;  %v491_v11 = vsel %vm319_vm13, %v834_v21, %v833_v2  ;;  %v492_v48 = vsel %vm319_vm13, %v833_v2, %v798_v61 }
 0x201   : > { %v738_v4 = vpack.c.bf16 %v482_v3, %v444_v23  ;;  %v741_v19 = vpack.c.bf16 %v481_v43, %v443_v22  ;;  %v837_v5 = vpop.permute.xlu0 %836  ;;  %v500_v12 = vpop.permute.xlu1 %499 }
 0x202   : > { %v839_v7 = vunpack.i.h.bf16 %v837_v5  ;;  %v838_v9 = vunpack.i.l.bf16 %v837_v5  ;;  %v502_v58 = vsel %vm332_vm5, %v500_v12, %v1056_v6 }
 0x203   : > { %740 = vmatprep.subr.msk.bf16.mxu1 %vm1025_vm15, %v738_v4 }
 0x204   : > { %v519_v20 = vsel %vm1176_vm1, %v839_v7, %v838_v9  ;;  %v520_v49 = vsel %vm1177_vm3, %v838_v9, %v803_v51  ;;  %743 = vmatpush1.bf16.msk.msra.mxu1 %vm1036_vm12, %v741_v19 }
 0x205   : > { %v744_v13 = vpack.c.bf16 %v520_v49, %v492_v48  ;;  %v747_v55 = vpack.c.bf16 %v519_v20, %v491_v11  ;;  %v498_v61 = vpop.permute.xlu0 %497 }
 0x206   : > { %v501_v51 = vsel %vm332_vm5, %v498_v61, %v500_v12 }
 0x207   : > { %746 = vmatprep.subr.msk.bf16.mxu1 %vm957_vm6, %v744_v13 }
 0x208   : > { %749 = vmatpush1.bf16.msk.msra.mxu1 %vm968_vm7, %v747_v55 }
 0x209   : > { %695 = vmatprep.subr.msk.mxu1 %vm972_vm9, %v502_v58 }
 0x20c   : > { %696 = vmatpush1.msk.msra.mxu1 %vm979_vm10, %v501_v51 }
 0x20d   : > { %697 = vmatmul.mubr.msk.f32.vlgmr.msra.gmra.mrb[0].mxu1 %vm368_vm14, %v523_v47 }
 0x212   : > { %v528_v28 = vpop.permute.xlu1 %527 }
 0x2e0   : > { %v599_v59 = vpop.f32.mrb[0].mxu1 }
 0x2e1   : > { %v600_v6 = vadd.f32 %v599_v59, %v528_v28  ;;  %v601_v14 = vpop.f32.mrb[1].mxu1 }
 0x2e2   : > { %v602_v34 = vadd.f32 %v601_v14, %v528_v28 }
 0x2e3   : > { %v604_v35 = vmax.f32 %v600_v6, 0.0 }
 0x2e4   : > { %v605_v15 = vmax.f32 %v602_v34, 0.0 }
 0x2e5   : > { %606 = vst [vmem:[%s224_s17] sm:$0xff] %v604_v35 }
 0x2e6   : > { %607 = vst [vmem:[%s224_s17 + $0x8] sm:$0xff] %v605_v15 }
 0x2e7 PF: > { %s15_s18 = sadd.s32 1, %s847_s18  }
 0x2e8   : > { %p12_p4 = scmp.ge.s32.totalorder %s15_s18, 4  }
 0x2ea   :  { %14 = sbr.rel (!%p12_p4) target bundleno = 1 (0x1), region = 70 }

</bundles_post_ra>
